<compile_context>
chip_gen: v6e
topology: v6e:2x2x1
jax: 0.10.0
libtpu: 0.0.40
codegen_flags: <defaults>
</compile_context>

<pallas_src>
import jax
import jax.numpy as jnp
from jax import lax
from jax.experimental import pallas as pl
from jax.experimental.pallas import tpu as pltpu


def _tpu_vmem_capacity_bytes():
    """Physical VMEM per core; conservative (v7x-sized) fallback if unqueryable."""
    try:
        return int(pltpu.get_tpu_info().vmem_capacity_bytes)
    except Exception:
        return 64 * 1024 * 1024


def _choose_blocks(n, c, hw, itemsize, per_block_bytes, vmem_cap):
    """Pick (bn, tile_hw, n_sp) for block_shape (bn, C, tile_hw)."""
    hw128 = pl.cdiv(hw, 128) * 128
    col_bytes = max(1, c * itemsize)

    # Largest 128-multiple lane tile whose single-batch block fits the target.
    cols_budget = max(128, (per_block_bytes // col_bytes) // 128 * 128)
    # Keep DMA segments reasonably long (>= 512 lanes) when the tensor has them.
    cols_floor = min(512, hw128)
    tile_hw = min(hw128, max(cols_budget, cols_floor))
    # Hard clamp: 2 in + 2 out buffered blocks must stay well under physical VMEM.
    hard_cols = max(128, ((vmem_cap // 2) // (4 * col_bytes)) // 128 * 128)
    tile_hw = max(128, min(tile_hw, hard_cols))
    n_sp = pl.cdiv(hw, tile_hw)

    # Prefer >= 4 total grid steps (keeps both v7x TensorCores busy) as long as
    # lane tiles stay wide enough.
    while n * n_sp < 4 and tile_hw > max(cols_floor, 128):
        new_tile = max(128, max(cols_floor, ((tile_hw // 2) + 127) // 128 * 128))
        if new_tile >= tile_hw:
            break
        tile_hw = new_tile
        n_sp = pl.cdiv(hw, tile_hw)

    # Batch-widen the block only when the whole spatial extent fits one tile and
    # there is budget left; keep >= ~8 batch steps when the batch is large.
    bn = 1
    if n_sp == 1 and n > 1:
        bn_budget = max(1, per_block_bytes // max(1, c * tile_hw * itemsize))
        bn_steps = max(1, n // 8) if n >= 8 else 1
        bn_limit = int(min(n, bn_budget, bn_steps))
        for d in range(bn_limit, 0, -1):
            if n % d == 0:          # divisor of N -> no partial batch blocks
                bn = d
                break
    return bn, tile_hw, n_sp


def _make_kernel(alpha, temperature, eps, clamp_max, hw, tile_hw):
    inv_t = float(1.0 / temperature)
    needs_mask = (hw % tile_hw) != 0   # partial final spatial block

    def kernel(x_ref, o_ref):
        # x_ref / o_ref: (bn, C, tile_hw) tile in VMEM.
        x = x_ref[...].astype(jnp.float32)

        if needs_mask:
            # Zero out-of-bounds lanes of the (padded) boundary block so garbage
            # never enters compute; their stores are discarded by Pallas anyway.
            col = lax.broadcasted_iota(jnp.int32, (1, 1, tile_hw), 2)
            valid = (pl.program_id(1) * tile_hw + col) < hw
            x = jnp.where(valid, x, jnp.float32(0.0))

        if temperature != 1.0:                        # static Python branch
            x = x * jnp.float32(inv_t)                # multiply, never divide

        # relu(x/T) + eps; result is already >= eps, so only the upper clamp matters.
        x = jnp.maximum(x, 0.0) + jnp.float32(eps)
        x = jnp.minimum(x, jnp.float32(clamp_max))

        # x ** alpha, specialized so the common cases avoid exp+log on the EUP.
        if alpha == 0.5:
            x = jnp.sqrt(x)
        elif alpha == 1.0:
            pass
        elif alpha == 2.0:
            x = x * x
        else:
            x = jnp.power(x, jnp.float32(alpha))

        # Channel-wise normalization: one approx reciprocal per HW column (EUP
        # work cut by C), one Newton step (VPU) for full precision, then a
        # broadcast multiply.
        denom = jnp.sum(x, axis=1, keepdims=True) + jnp.float32(eps)
        inv = pl.reciprocal(denom, approx=True)
        inv = inv * (jnp.float32(2.0) - denom * inv)

        o_ref[...] = (x * inv).astype(o_ref.dtype)

    return kernel


def temperature_power_norm(x, alpha=0.5, temperature=1.0, eps=1e-6,
                           clamp_max=1e6, donate=False):
    """x: (N, C, H, W) NCHW. Returns array of same shape/dtype."""
    N, C, H, W = x.shape
    HW = H * W
    x3 = x.reshape(N, C, HW)              # channel reduction -> sublane axis
    itemsize = x.dtype.itemsize

    vmem_cap = _tpu_vmem_capacity_bytes()
    # Target a few MiB per buffered block (>=85% of HBM roofline), generation-aware.
    per_block = min(8 << 20, max(2 << 20, vmem_cap // 8))
    bn, tile_hw, n_sp = _choose_blocks(N, C, HW, itemsize, per_block, vmem_cap)

    block_bytes = bn * C * tile_hw * itemsize
    # 2 in + 2 out buffered blocks + headroom; raise above the scoped default but
    # stay well inside physical VMEM (v7x: 64 MiB).
    vmem_limit = int(min(int(vmem_cap * 0.9),
                         max(32 << 20, 4 * block_bytes + (8 << 20))))

    kernel = _make_kernel(alpha, temperature, eps, clamp_max, HW, tile_hw)
    spec = pl.BlockSpec((bn, C, tile_hw), lambda n, s: (n, 0, s))

    out3 = pl.pallas_call(
        kernel,
        out_shape=jax.ShapeDtypeStruct((N, C, HW), x.dtype),
        grid_spec=pltpu.PrefetchScalarGridSpec(
            num_scalar_prefetch=0,
            grid=(pl.cdiv(N, bn), n_sp),
            in_specs=[spec],
            out_specs=spec,
        ),
        compiler_params=pltpu.CompilerParams(
            dimension_semantics=("parallel", "parallel"),
            vmem_limit_bytes=vmem_limit,
        ),
        input_output_aliases=({0: 0} if donate else {}),
    )(x3)

    return out3.reshape(N, C, H, W)


def _reference(x, alpha=0.5, temperature=1.0, eps=1e-6, clamp_max=1e6):
    # Pure-JAX reference mirroring the PyTorch forward.
    xf = x.astype(jnp.float32)
    xf = jnp.maximum(xf / temperature, 0.0) + eps
    xf = jnp.clip(xf, eps, clamp_max)
    xf = jnp.power(xf, alpha)
    return (xf / (jnp.sum(xf, axis=1, keepdims=True) + eps)).astype(x.dtype)


if __name__ == "__main__":
    key = jax.random.PRNGKey(0)

    # Main case (matches the module's expected NCHW usage); HW=256 is 128-aligned.
    x = jax.random.normal(key, (2, 4, 16, 16), dtype=jnp.float32)
    out = temperature_power_norm(x)
    jax.block_until_ready(out)
    ref = _reference(x)
    assert out.shape == x.shape and out.dtype == x.dtype
    assert jnp.allclose(out, ref, atol=1e-5, rtol=1e-4)

    # Non-128-multiple spatial size (HW=100) exercises the partial-boundary-block
    # + lane-mask path (no wrapper pad / slice anymore).
    x2 = jax.random.normal(jax.random.PRNGKey(1), (2, 4, 10, 10), dtype=jnp.float32)
    out2 = temperature_power_norm(x2)
    jax.block_until_ready(out2)
    ref2 = _reference(x2)
    assert out2.shape == x2.shape and out2.dtype == x2.dtype
    assert jnp.allclose(out2, ref2, atol=1e-5, rtol=1e-4)

    print("KERNEL_OK")
</pallas_src>

<mosaic_0001>
module attributes {stable_mosaic.version = 11 : i64} {
  func.func @kernel(%arg0: i32, %arg1: i32, %arg2: memref<1x4x256xf32, #tpu.memory_space<vmem>>, %arg3: memref<1x4x256xf32, #tpu.memory_space<vmem>>) attributes {dimension_semantics = [#tpu.dimension_semantics<parallel>, #tpu.dimension_semantics<parallel>], iteration_bounds = array<i64: 2, 1>, scalar_prefetch = 0 : i64, scratch_operands = 0 : i64, tpu.core_type = #tpu.core_type<tc>, window_params = [{transform_indices = @transform_0, window_bounds = array<i64: 1, 4, 256>}, {transform_indices = @transform_1, window_bounds = array<i64: 1, 4, 256>}]} {
    %c0 = arith.constant 0 : index
    %c0_0 = arith.constant 0 : index
    %c0_1 = arith.constant 0 : index
    %0 = vector.load %arg2[%c0, %c0_0, %c0_1] : memref<1x4x256xf32, #tpu.memory_space<vmem>>, vector<1x4x256xf32>
    %cst = arith.constant 0.000000e+00 : f32
    %1 = vector.broadcast %cst : f32 to vector<1x4x256xf32>
    %2 = arith.maximumf %0, %1 : vector<1x4x256xf32>
    %cst_2 = arith.constant 9.99999997E-7 : f32
    %3 = vector.broadcast %cst_2 : f32 to vector<1x4x256xf32>
    %4 = arith.addf %2, %3 : vector<1x4x256xf32>
    %cst_3 = arith.constant 1.000000e+06 : f32
    %5 = vector.broadcast %cst_3 : f32 to vector<1x4x256xf32>
    %6 = arith.minimumf %4, %5 : vector<1x4x256xf32>
    %7 = math.sqrt %6 : vector<1x4x256xf32>
    %cst_4 = arith.constant dense<0.000000e+00> : vector<1x256xf32>
    %8 = vector.multi_reduction <add>, %7, %cst_4 [1] : vector<1x4x256xf32> to vector<1x256xf32>
    %9 = vector.shape_cast %8 : vector<1x256xf32> to vector<1x1x256xf32>
    %cst_5 = arith.constant 9.99999997E-7 : f32
    %10 = vector.broadcast %cst_5 : f32 to vector<1x1x256xf32>
    %11 = arith.addf %9, %10 : vector<1x1x256xf32>
    %12 = tpu.reciprocal %11 {approx = true} : vector<1x1x256xf32> -> vector<1x1x256xf32>
    %13 = arith.mulf %11, %12 : vector<1x1x256xf32>
    %cst_6 = arith.constant 2.000000e+00 : f32
    %14 = vector.broadcast %cst_6 : f32 to vector<1x1x256xf32>
    %15 = arith.subf %14, %13 : vector<1x1x256xf32>
    %16 = arith.mulf %12, %15 : vector<1x1x256xf32>
    %17 = vector.broadcast %16 : vector<1x1x256xf32> to vector<1x4x256xf32>
    %18 = arith.mulf %7, %17 : vector<1x4x256xf32>
    %c0_7 = arith.constant 0 : index
    %c0_8 = arith.constant 0 : index
    %c0_9 = arith.constant 0 : index
    %19 = vector.load %arg3[%c0_7, %c0_8, %c0_9] : memref<1x4x256xf32, #tpu.memory_space<vmem>>, vector<1x4x256xf32>
    tpu.vector_store %arg3[%c0_7, %c0_8, %c0_9], %18 {strides = array<i32>} : memref<1x4x256xf32, #tpu.memory_space<vmem>>, vector<1x4x256xf32>,
    return
  }
  func.func @transform_0(%arg0: i32, %arg1: i32) -> (i32, i32, i32) {
    %c0_i32 = arith.constant 0 : i32
    %c0_i32_0 = arith.constant 0 : i32
    return %arg0, %c0_i32, %arg1 : i32, i32, i32
  }
  func.func @transform_1(%arg0: i32, %arg1: i32) -> (i32, i32, i32) {
    %c0_i32 = arith.constant 0 : i32
    %c0_i32_0 = arith.constant 0 : i32
    return %arg0, %c0_i32, %arg1 : i32, i32, i32
  }
}

</mosaic_0001>

<bundles_post_ra>
// kernel: tpu_custom_call.1
= control target key start
LH: loop header
LB: loop body
LE: loop exit
PB: predicated region body
PF: predicated region fallthrough
CT: control target
= control target key end

     0   :  { %6 = vsyncpa [#allocation3], 0  ;;  %s644_s0 = inlined_call_operand.hbm [shape: f32[2,4,256], index: 0, kind: input, shape index: {}]   ;;  %s645_s1 = inlined_call_operand.hbm [shape: f32[2,4,256], index: 1, kind: output, shape index: {}]  }
   0x1   :  { %8 = vsyncpa [#allocation3 + $0x1], 0 }
   0x2   :  { %9 = vsyncpa [#allocation4], 0 }
   0x3   :  { %11 = vsyncpa [#allocation4 + $0x1], 0  ;;  %s506_s6 = smov 0   ;;  %s508_s7 = smov 0  }
   0x4   :  { %s510_s8 = smov 0   ;;  %s512_s9 = smov 0  }
   0x5   :  { %s514_s10 = smov 0   ;;  %s516_s11 = smov 0  }
   0x6 LB: > { %s299_s12 = sadd.s32 4294967295, %s492_s11   ;;  %s300_s13 = sadd.s32 4294967294, %s492_s11   ;;  %s492_s11 = sphi %s516_s11, %s17_s11   ;;  %s488_s10 = sphi %s514_s10, %s657_s10   ;;  %s484_s9 = sphi %s512_s9, %s656_s9   ;;  %s480_s8 = sphi %s510_s8, %s655_s8   ;;  %s476_s7 = sphi %s508_s7, %s654_s7   ;;  %s472_s6 = sphi %s506_s6, %s653_s6  }
   0x7   : > { %s29_s14 = sadd.s32 1, %s488_s10  ;;  %s38_s15 = sadd.s32 1, %s480_s8 }
   0x8   : > { %p31_p0 = scmp.ge.s32.totalorder %s29_s14, 2  ;;  %p45_p1 = scmp.ne.s32.totalorder %s480_s8, %s476_s7 }
   0x9   : > { %p46_p2 = scmp.eq.s32.totalorder %s492_s11, 0  ;;  %p51_p3 = scmp.ne.s32.totalorder %s476_s7, %s472_s6 }
   0xa   : > { %s659_s14 = smov (%p31_p0, %s29_s14), 0  ;;  %p52_p5 = scmp.eq.s32.totalorder %s299_s12, 0 }
   0xb   : > { %p547_p4 = por %p46_p2, %p45_p1  ;;  %s33_s17 = ssub.s32 %s488_s10, %s659_s14 }
   0xc   : > { %p77_p6 = scmp.eq.s32.totalorder %s299_s12, 1  ;;  %p36_p7 = scmp.eq.s32.totalorder %s33_s17, 0 }
   0xd   : > { %p553_p8 = por %p52_p5, %p51_p3  ;;  %p83_p10 = scmp.eq.s32.totalorder %s300_s13, 1 }
   0xe   : > { %p557_p9 = por %p77_p6, %p45_p1  ;;  %p328_p13 = scmp.lt.s32.totalorder %s492_s11, 2 }
   0xf   : > { %s562_s20 = scalar_select %p36_p7, %s480_s8, %s38_s15  }
  0x10   : > { %p564_p11 = por %p83_p10, %p51_p3  ;;  %s103_s22 = sand.u32 1, %s480_s8  }
  0x11   : > { %s303_s23 = sshll.u32 %s103_s22, 3  ;;  %s314_s24 = sshll.u32 %s488_s10, 7 }
  0x12   : > { %s649_s21 = scalar_select %p564_p11, 1, 0 }
  0x13   : > { %s115_s27 = scalar_lea.hbm %s644_s0, %s314_s24  ;;  %s107_s28 = scalar_lea.vmem [#allocation2], %s303_s23 }
  0x14   : > { %s117_s29 = sshll.u32 %s107_s28, 4  ;;  %p577_p0 = pnand %p328_p13, %p547_p4  ;;  %s118_s29 = int_to_ptr.vmem [resolvable:$true] %s117_s29 }
  0x15   : > { %p306_p1 = scmp.ge.s32.totalorder %s492_s11, 1  ;;  %p122_p2 = scmp.lt.s32.totalorder %s492_s11, 3 }
  0x16   : > { %s104_s2 = scalar_lea.sflag [#allocation3], %s103_s22  ;;  %p386_p3 = pneg %p577_p0 }
  0x17   : > { %s397_s3 = scalar_lea.vmem %s118_s29, 128  ;;  %s494_s4 = smov [#allocation2]  }
  0x18   : > { %p398_p5 = scmp.ne.s32.totalorder %s118_s29, %s397_s3  ;;  %s402_s5 = sshll.u32 %s494_s4, 4  ;;  %s403_s5 = int_to_ptr.vmem [resolvable:$false] %s402_s5 }
  0x19   : > { %s404_s12 = scalar_lea.vmem %s403_s5, 256  ;;  %p405_p10 = scmp.lt.s32.totalorder %s118_s29, %s403_s5 }
  0x1a   : > { %p400_p6 = pnand %p398_p5, %p386_p3  ;;  %p406_p12 = scmp.lt.s32.totalorder %s404_s12, %s397_s3 }
  0x1c   : > { %p401_p7 = pneg %p400_p6  ;;  %p407_p4 = por %p406_p12, %p405_p10 }
  0x1e   : > { %p408_p13 = pnand %p407_p4, %p401_p7 }
  0x20   : > { %411 = shalt.err (!%p408_p13)
}
  0x21   : > { %323 = dma.hbm_to_vmem [thread:$0]  (!%p577_p0), %s115_s27, 128, %s118_s29, %s104_s2  }
  0x22   : > { %p123_p11 = pnand %p306_p1, %p122_p2 }
  0x23   : > { %s592_s13 = sand.u32 (!%p123_p11), 1, %s476_s7  }
  0x24   : > { %126 = sbr.rel (%p123_p11) target bundleno = 121 (0x79), region = 24  ;;  %s307_s15 = sshll.u32 (!%p123_p11), %s592_s13, 3 }
  0x25   : > { %s129_s16 = scalar_lea.sflag (!%p123_p11), [#allocation3], %s592_s13  ;;  %s132_s17 = scalar_lea.vmem (!%p123_p11), [#allocation2], %s307_s15 }
  0x29   : > { %463 = dma.done.wait (%p553_p8), %s129_s16, 128  }
  0x2a   : > { %465 = vsyncadd (%p553_p8), %s129_s16, 4294967168  ;;  %v153_v0 = vld [vmem:[%s132_s17] sm:$0xff]  ;;  %vm167_vm2 = vcmask 1043456   ;;  %s150_s18 = scalar_lea.vmem [#allocation5], %s307_s15  ;;  %s315_s23 = sshll.u32 %s484_s9, 7 }
  0x2b   : > { %v154_v1 = vmax.f32 %v153_v0, 0.0  ;;  %s215_s22 = sshll.u32 %s150_s18, 4  ;;  %s213_s26 = scalar_lea.hbm %s645_s1, %s315_s23  ;;  %s216_s22 = int_to_ptr.vmem [resolvable:$true] %s215_s22 }
  0x2c   : > { %s199_s27 = scalar_lea.sflag [#allocation4], %s592_s13  ;;  %s412_s28 = scalar_lea.vmem %s216_s22, 128 }
  0x2d   : > { %v155_v2 = vadd.f32 1e-06, %v154_v1  ;;  %p413_p8 = scmp.ne.s32.totalorder %s216_s22, %s412_s28  ;;  %s495_s29 = smov [#allocation5]  }
  0x2e   : > { %s416_s30 = sshll.u32 %s495_s29, 4  ;;  %s417_s30 = int_to_ptr.vmem [resolvable:$false] %s416_s30 }
  0x2f   : > { %v156_v3 = vmin.f32 %v155_v2, 1000000.0  ;;  %p414_p11 = pnand %p413_p8, %p557_p9  ;;  %s418_s2 = scalar_lea.vmem %s417_s30, 256 }
  0x30   : > { %p419_p0 = scmp.lt.s32.totalorder %s216_s22, %s417_s30  ;;  %p420_p1 = scmp.lt.s32.totalorder %s418_s2, %s412_s28 }
  0x31   : > { %378 = vrsqrt.f32 %v156_v3  ;;  %vm159_vm0 = vcmp.eq.f32.partialorder %v156_v3, inf  ;;  %v162_v5 = vand.u32 2147483648, %v156_v3  ;;  %vm161_vm1 = vcmp.eq.f32.partialorder %v156_v3, 0.0  ;;  %p415_p12 = pneg %p414_p11 }
  0x32   : > { %p421_p2 = por %p420_p1, %p419_p0 }
  0x34   : > { %p422_p3 = pnand %p421_p2, %p415_p12 }
  0x3e   : > { %v379_v4 = vpop.eup %378 }
  0x3f   : > { %v158_v6 = vmul.f32 %v379_v4, %v156_v3 }
  0x41   : > { %v160_v7 = vsel %vm159_vm0, %v156_v3, %v158_v6 }
  0x42   : > { %v163_v8 = vsel %vm161_vm1, %v162_v5, %v160_v7 }
  0x43   : > { %v165_v9 = vcombine.high %v163_v8, %v163_v8  ;;  %v168_v10 = vsel %vm167_vm2, %v163_v8, 0.0 }
  0x44   : > { %v169_v11 = vrot.slane %v168_v10, 4 }
  0x45   : > { %v175_v12 = vsel %vm167_vm2, %v165_v9, 0.0 }
  0x46   : > { %v170_v13 = vadd.f32 %v169_v11, %v168_v10  ;;  %v176_v14 = vrot.slane %v175_v12, 4 }
  0x48   : > { %v171_v15 = vrot.slane %v170_v13, 2  ;;  %v177_v16 = vadd.f32 %v176_v14, %v175_v12 }
  0x4a   : > { %v172_v17 = vadd.f32 %v171_v15, %v170_v13  ;;  %v178_v18 = vrot.slane %v177_v16, 2 }
  0x4c   : > { %v173_v19 = vrot.slane %v172_v17, 1  ;;  %v179_v20 = vadd.f32 %v178_v18, %v177_v16 }
  0x4e   : > { %v174_v21 = vadd.f32 %v173_v19, %v172_v17  ;;  %v180_v22 = vrot.slane %v179_v20, 1 }
  0x50   : > { %v181_v23 = vadd.f32 %v180_v22, %v179_v20  ;;  %v182_v24 = vadd.f32 1e-06, %v174_v21 }
  0x52   : > { %v183_v25 = vadd.f32 1e-06, %v181_v23  ;;  %380 = vrcp.f32 %v182_v24 }
  0x54   : > { %382 = vrcp.f32 %v183_v25 }
  0x5f   : > { %v381_v26 = vpop.eup %380 }
  0x60   : > { %v186_v27 = vmul.f32 %v381_v26, %v182_v24 }
  0x61   : > { %v383_v28 = vpop.eup %382 }
  0x62   : > { %v187_v29 = vmul.f32 %v383_v28, %v183_v25  ;;  %v188_v30 = vsub.f32 2.0, %v186_v27 }
  0x64   : > { %v189_v31 = vsub.f32 2.0, %v187_v29  ;;  %v190_v32 = vmul.f32 %v381_v26, %v188_v30 }
  0x66   : > { %v191_v33 = vmul.f32 %v383_v28, %v189_v31 }
  0x68   : > { %v194_v34 = vcombine.low %v190_v32, %v191_v33 }
  0x6a   : > { %v196_v35 = vmul.f32 %v194_v34, %v163_v8 }
  0x6c   : > { %197 = vst [vmem:[%s150_s18] sm:$0xff] %v196_v35 }
  0x6d   : > { %425 = shalt.err (!%p422_p3)
}
  0x6e   : > { %s426_s9 = scalar_lea.hbm %s213_s26, 128  ;;  %s430_s5 = scalar_lea.hbm %s645_s1, 256 }
  0x6f   : > { %p427_p5 = scmp.ne.s32.totalorder %s213_s26, %s426_s9  ;;  %p431_p10 = scmp.lt.s32.totalorder %s213_s26, %s645_s1 }
  0x70   : > { %p432_p4 = scmp.lt.s32.totalorder %s430_s5, %s426_s9 }
  0x71   : > { %p428_p6 = pnand %p427_p5, %p557_p9 }
  0x72   : > { %p433_p13 = por %p432_p4, %p431_p10 }
  0x73   : > { %p429_p7 = pneg %p428_p6 }
  0x75   : > { %p434_p8 = pnand %p433_p13, %p429_p7 }
  0x77   : > { %437 = shalt.err (!%p434_p8)
}
  0x78   : > { %318 = dma.vmem_to_hbm [thread:$0]  (%p557_p9), %s216_s22, 128, %s213_s26, %s199_s27  }
  0x79 PF: > { %s227_s15 = sand.u32 1, %s472_s6   ;;  %p651_p11 = scmp.ne.s32.totalorder %s649_s21, 0 }
  0x7a   : > { %p652_p12 = scmp.ge.s32.totalorder %s492_s11, 2  ;;  %s228_s16 = scalar_lea.sflag [#allocation4], %s227_s15 }
  0x7c   : > { %p325_p0 = pnand %p652_p12, %p651_p11 }
  0x7e   : > { %p326_p1 = pneg %p325_p0 }
  0x80   : > { %467 = dma.done.wait (%p326_p1), %s228_s16, 128  }
  0x81   : > { %469 = vsyncadd (%p326_p1), %s228_s16, 4294967168  ;;  %s17_s11 = sadd.s32 1, %s492_s11   ;;  %s653_s6 = smov %s476_s7 }
  0x82   : > { %p14_p2 = scmp.ge.s32.totalorder %s17_s11, 4   ;;  %s654_s7 = smov %s480_s8 }
  0x83   : > { %s655_s8 = smov %s562_s20  ;;  %s656_s9 = smov %s488_s10 }
  0x84   : > { %s657_s10 = smov %s659_s14  ;;  %16 = sbr.rel (!%p14_p2) target bundleno = 6 (0x6), region = 69 }
  0x89   :  { %233 = vsyncpa [#allocation3], 1 }
  0x8a   :  { %235 = vsyncpa [#allocation3 + $0x1], 1 }
  0x8b   :  { %236 = vsyncpa [#allocation4], 1 }
  0x8c   :  { %238 = vsyncpa [#allocation4 + $0x1], 1 }

</bundles_post_ra>
